<compile_context>
chip_gen: v5e
topology: v5e:2x2
jax: 0.10.0
libtpu: 0.0.40
codegen_flags: <defaults>
</compile_context>

<pallas_src>
import functools

import jax
import jax.numpy as jnp
from jax.experimental import pallas as pl
from jax.experimental.pallas import tpu as pltpu

NEIGHBORHOOD_SIZE = 3


# ---------------------------------------------------------------------------
# helpers
# ---------------------------------------------------------------------------
def _round_up(x: int, m: int) -> int:
    return (x + m - 1) // m * m


# ---------------------------------------------------------------------------
# Pallas kernel: (C_out, K) . (TN, K)^T + bias on the MXU, f32 accumulate,
# output stored directly in (C_out, TN) i.e. NCW layout.
# ---------------------------------------------------------------------------
def _btconv_kernel(x_ref, w_ref, b_ref, o_ref, *, precision):
    # x_ref: (TN, K)   w_ref: (C_out, K)   b_ref: (C_out, 1)   o_ref: (C_out, TN)
    acc = jax.lax.dot_general(
        w_ref[...], x_ref[...],
        dimension_numbers=(((1,), (1,)), ((), ())),   # contract K (last dim of both)
        preferred_element_type=jnp.float32,
        precision=precision)
    o_ref[...] = (acc + b_ref[...]).astype(o_ref.dtype)


def _btconv_pallas(x, w, b, *, tile_n, out_dtype):
    """x: (B, N_pad, K), w: (C_out, K), b: (C_out, 1) -> (B, C_out, N_pad) out_dtype."""
    B, N_pad, K = x.shape
    C_out = w.shape[0]
    assert N_pad % tile_n == 0 and tile_n % 8 == 0

    x_bytes = x.dtype.itemsize
    w_bytes = w.dtype.itemsize
    o_bytes = jnp.dtype(out_dtype).itemsize

    # Double-buffered x/out tiles + resident weight/bias.  Cap well below v7x's
    # 64 MiB per-TensorCore VMEM (96 MiB would be physically invalid there).
    est_vmem = (2 * tile_n * K * x_bytes
                + 2 * C_out * tile_n * o_bytes
                + 2 * K * C_out * w_bytes
                + 2 * C_out * 4)
    vmem_limit = min(max(2 * est_vmem + (8 << 20), 32 << 20), 48 << 20)

    cost = pl.CostEstimate(
        flops=2 * B * N_pad * K * C_out,
        transcendentals=0,
        bytes_accessed=(x.size * x_bytes + w.size * w_bytes + b.size * 4
                        + B * C_out * N_pad * o_bytes),
    )

    # f32 path: multi-pass f32 matmul for bit-level-robust parity at any size.
    precision = (jax.lax.Precision.HIGHEST if x.dtype == jnp.float32
                 else jax.lax.Precision.DEFAULT)
    kernel = functools.partial(_btconv_kernel, precision=precision)

    return pl.pallas_call(
        kernel,
        out_shape=jax.ShapeDtypeStruct((B, C_out, N_pad), out_dtype),
        grid_spec=pltpu.PrefetchScalarGridSpec(
            num_scalar_prefetch=0,
            grid=(B, N_pad // tile_n),
            in_specs=[
                # x is the only streamed input; natural K last dim (full extent, no
                # HBM-side padding).  If a profile ever shows exposed x DMA, deepen
                # the pipeline here with `pipeline_mode=pl.Buffered(3)`.
                pl.BlockSpec((None, tile_n, K), lambda bi, ni: (bi, ni, 0)),
                pl.BlockSpec((C_out, K), lambda bi, ni: (0, 0)),   # weight, resident
                pl.BlockSpec((C_out, 1), lambda bi, ni: (0, 0)),   # bias, resident
            ],
            # Output stored transposed-in-kernel: lane dim = tile_n (lane-dense even
            # when C_out < 128), and no NWC->NCW pass is needed outside the kernel.
            out_specs=pl.BlockSpec((None, C_out, tile_n), lambda bi, ni: (bi, 0, ni)),
        ),
        compiler_params=pltpu.CompilerParams(
            # Both axes fully independent.  (On v7x, pltpu.CORE_PARALLEL on the N-tile
            # axis is worth an experiment for explicit cross-core sharding.)
            dimension_semantics=("parallel", "parallel"),
            vmem_limit_bytes=vmem_limit,
        ),
        cost_estimate=cost,
    )(x, w, b)


# ---------------------------------------------------------------------------
# Module-equivalent wrapper (gather / padding glue in plain JAX)
# ---------------------------------------------------------------------------
def binary_tree_conv(vertices, edges, weight, bias, *,
                     compute_dtype=jnp.bfloat16, out_dtype=None, tile_n=2048):
    """
    vertices: (B, C_in, N) float32
    edges:    (B, 1, N, NEIGHBORHOOD_SIZE) int32, indices in [0, N] (0 = pad vertex)
    weight:   (C_out, C_in, NEIGHBORHOOD_SIZE) float32 (Conv1d weight)
    bias:     (C_out,) float32
    returns:  (B, C_out, N) in `out_dtype` (default: vertices.dtype)
    """
    assert vertices.ndim == 3, "vertices must be (batch, channel, node)"
    assert edges.ndim == 4, "edges must be (batch, channel, node, neighbor)"
    assert edges.shape[1] == 1, "edges channel dim must be 1"
    assert edges.shape[-1] == NEIGHBORHOOD_SIZE

    B, C_in, N = vertices.shape
    C_out = weight.shape[0]
    K = C_in * NEIGHBORHOOD_SIZE
    if out_dtype is None:
        out_dtype = vertices.dtype

    # --- node-major layout + zero padding vertex (single cheap transpose of the
    # un-expanded 1x tensor); the gather produces (B, N, 3, C_in) in the layout the
    # kernel consumes, in the compute dtype (bf16 on the fast path).
    # TODO(synk): for large C_in, move this gather in-kernel (vertices block resident
    # in VMEM + per-tile edges block) so the 3x-expanded tensor never touches HBM.
    v_nm = jnp.transpose(vertices, (0, 2, 1)).astype(compute_dtype)       # (B, N, C_in)
    padded = jnp.concatenate(
        [jnp.zeros((B, 1, C_in), compute_dtype), v_nm], axis=1)           # (B, N+1, C_in)
    idx = edges[:, 0].astype(jnp.int32)                                   # (B, N, 3)
    nbh = jax.vmap(lambda p, i: p[i])(padded, idx)                        # (B, N, 3, C_in)
    x = nbh.reshape(B, N, K)                                              # natural K, no pad

    # --- weight as (C_out, K) in matching k-major order: w2[o, k*C_in + c] = weight[o, c, k]
    w2 = jnp.transpose(weight, (0, 2, 1)).reshape(C_out, K).astype(compute_dtype)
    b2 = bias.reshape(C_out, 1).astype(jnp.float32)

    # --- N tiling.  Single-tile regime uses the natural (8-aligned) extent (full-extent
    # last dim on the output block is layout-legal); multi-tile regime uses 128-aligned
    # tiles so the lane-dense output store stays unmasked.  When B == 1, keep >= 2 tiles
    # (when N allows) so v7x's two TensorCores both get work.
    N8 = _round_up(N, 8)
    cap = max(128, _round_up(int(tile_n), 128))
    if B == 1:
        cap = min(cap, max(128, _round_up(N8 // 2, 128)))
    if N8 <= cap:
        TN = N8
        N_pad = N8
    else:
        ntiles = -(-N8 // cap)
        TN = _round_up(-(-N8 // ntiles), 128)
        N_pad = ntiles * TN

    x = jnp.pad(x, ((0, 0), (0, N_pad - N), (0, 0)))

    out = _btconv_pallas(x, w2, b2, tile_n=TN, out_dtype=out_dtype)   # (B, C_out, N_pad)
    return out[:, :, :N]                                              # strip N padding


# ---------------------------------------------------------------------------
# Pure-JAX reference (mirrors the PyTorch forward exactly, f32)
# ---------------------------------------------------------------------------
def binary_tree_conv_ref(vertices, edges, weight, bias):
    B, C_in, N = vertices.shape
    padded = jnp.concatenate(
        [jnp.zeros((B, C_in, 1), vertices.dtype), vertices], axis=2)
    idx = jnp.broadcast_to(edges, (B, C_in, N, NEIGHBORHOOD_SIZE)).astype(jnp.int32)
    backbone = jnp.broadcast_to(padded[..., None], (B, C_in, N + 1, NEIGHBORHOOD_SIZE))
    neighborhoods = jnp.take_along_axis(backbone, idx, axis=2)            # (B, C_in, N, 3)
    out = jnp.einsum("ock,bcnk->bon", weight, neighborhoods) + bias[None, :, None]
    return out


if __name__ == "__main__":
    B, C_in, C_out, N = 2, 4, 8, 16

    key = jax.random.PRNGKey(0)
    k_v, k_e, k_w, k_b = jax.random.split(key, 4)

    vertices = jax.random.normal(k_v, (B, C_in, N), dtype=jnp.float32)
    # indices into the padded vertex list: 0 (padding vertex) .. N
    edges = jax.random.randint(
        k_e, (B, 1, N, NEIGHBORHOOD_SIZE), minval=0, maxval=N + 1, dtype=jnp.int32)

    # Conv1d-style init: U(-sqrt(k), sqrt(k)), k = 1/(C_in*kernel)
    bound = 1.0 / jnp.sqrt(jnp.float32(C_in * NEIGHBORHOOD_SIZE))
    weight = jax.random.uniform(
        k_w, (C_out, C_in, NEIGHBORHOOD_SIZE), jnp.float32, -bound, bound)
    bias = jax.random.uniform(k_b, (C_out,), jnp.float32, -bound, bound)

    ref = binary_tree_conv_ref(vertices, edges, weight, bias)

    # f32 path: exactness check against the reference (HIGHEST-precision matmul).
    out_f32 = jax.block_until_ready(
        binary_tree_conv(vertices, edges, weight, bias, compute_dtype=jnp.float32))
    assert out_f32.shape == (B, C_out, N), out_f32.shape
    assert out_f32.dtype == vertices.dtype
    assert jnp.allclose(out_f32, ref, atol=1e-5, rtol=1e-5), "f32 mismatch vs reference"

    # Fast path: bf16 streams in AND out, f32 accumulate inside the kernel.
    out_bf16 = jax.block_until_ready(
        binary_tree_conv(vertices, edges, weight, bias,
                         compute_dtype=jnp.bfloat16, out_dtype=jnp.bfloat16))
    assert out_bf16.shape == (B, C_out, N), out_bf16.shape
    assert out_bf16.dtype == jnp.bfloat16
    assert jnp.allclose(out_bf16.astype(jnp.float32), ref, atol=2e-2, rtol=2e-2), \
        "bf16 mismatch vs reference"

    print("KERNEL_OK")
</pallas_src>

<mosaic_0001>
module attributes {stable_mosaic.version = 11 : i64} {
  func.func @_btconv_kernel(%arg0: i32, %arg1: i32, %arg2: memref<1x16x12xf32, #tpu.memory_space<vmem>>, %arg3: memref<8x12xf32, #tpu.memory_space<vmem>>, %arg4: memref<8x1xf32, #tpu.memory_space<vmem>>, %arg5: memref<1x8x16xf32, #tpu.memory_space<vmem>>) attributes {dimension_semantics = [#tpu.dimension_semantics<parallel>, #tpu.dimension_semantics<parallel>], iteration_bounds = array<i64: 2, 1>, scalar_prefetch = 0 : i64, scratch_operands = 0 : i64, tpu.core_type = #tpu.core_type<tc>, window_params = [{transform_indices = @transform_0, window_bounds = array<i64: 1, 16, 12>}, {pipeline_mode = #tpu.pipeline_mode<synchronous>, transform_indices = @transform_1, window_bounds = array<i64: 8, 12>}, {pipeline_mode = #tpu.pipeline_mode<synchronous>, transform_indices = @transform_2, window_bounds = array<i64: 8, 1>}, {transform_indices = @transform_3, window_bounds = array<i64: 1, 8, 16>}]} {
    %c0 = arith.constant 0 : index
    %c0_0 = arith.constant 0 : index
    %0 = vector.load %arg3[%c0, %c0_0] : memref<8x12xf32, #tpu.memory_space<vmem>>, vector<8x12xf32>
    %c0_1 = arith.constant 0 : index
    %c0_2 = arith.constant 0 : index
    %c0_3 = arith.constant 0 : index
    %1 = vector.load %arg2[%c0_1, %c0_2, %c0_3] : memref<1x16x12xf32, #tpu.memory_space<vmem>>, vector<1x16x12xf32>
    %2 = vector.shape_cast %1 : vector<1x16x12xf32> to vector<16x12xf32>
    %cst = arith.constant dense<0.000000e+00> : vector<8x16xf32>
    %3 = tpu.matmul %0, %2, %cst {dimension_numbers = #tpu.dot_dimension_numbers<[1], [1], [0], [0], [0, 0, 1, 0], [], []>, precision = #tpu.contract_precision<fp32>} : vector<8x12xf32>, vector<16x12xf32>, vector<8x16xf32> -> vector<8x16xf32>
    %c0_4 = arith.constant 0 : index
    %c0_5 = arith.constant 0 : index
    %4 = vector.load %arg4[%c0_4, %c0_5] : memref<8x1xf32, #tpu.memory_space<vmem>>, vector<8x1xf32>
    %5 = vector.broadcast %4 : vector<8x1xf32> to vector<8x16xf32>
    %6 = arith.addf %3, %5 : vector<8x16xf32>
    %c0_6 = arith.constant 0 : index
    %c0_7 = arith.constant 0 : index
    %c0_8 = arith.constant 0 : index
    %7 = vector.load %arg5[%c0_6, %c0_7, %c0_8] : memref<1x8x16xf32, #tpu.memory_space<vmem>>, vector<1x8x16xf32>
    %8 = vector.shape_cast %7 : vector<1x8x16xf32> to vector<8x16xf32>
    %9 = vector.shape_cast %6 : vector<8x16xf32> to vector<1x8x16xf32>
    tpu.vector_store %arg5[%c0_6, %c0_7, %c0_8], %9 {strides = array<i32>} : memref<1x8x16xf32, #tpu.memory_space<vmem>>, vector<1x8x16xf32>,
    return
  }
  func.func @transform_0(%arg0: i32, %arg1: i32) -> (i32, i32, i32) {
    %c0_i32 = arith.constant 0 : i32
    %c0_i32_0 = arith.constant 0 : i32
    return %arg0, %arg1, %c0_i32 : i32, i32, i32
  }
  func.func @transform_1(%arg0: i32, %arg1: i32) -> (i32, i32) {
    %c0_i32 = arith.constant 0 : i32
    %c0_i32_0 = arith.constant 0 : i32
    %c0_i32_1 = arith.constant 0 : i32
    return %c0_i32, %c0_i32_0 : i32, i32
  }
  func.func @transform_2(%arg0: i32, %arg1: i32) -> (i32, i32) {
    %c0_i32 = arith.constant 0 : i32
    %c0_i32_0 = arith.constant 0 : i32
    %c0_i32_1 = arith.constant 0 : i32
    return %c0_i32, %c0_i32_0 : i32, i32
  }
  func.func @transform_3(%arg0: i32, %arg1: i32) -> (i32, i32, i32) {
    %c0_i32 = arith.constant 0 : i32
    %c0_i32_0 = arith.constant 0 : i32
    return %arg0, %c0_i32, %arg1 : i32, i32, i32
  }
}

</mosaic_0001>

<bundles_post_ra>
// kernel: tpu_custom_call.1
= control target key start
LH: loop header
LB: loop body
LE: loop exit
PB: predicated region body
PF: predicated region fallthrough
CT: control target
= control target key end

     0   :  { %8 = vsyncpa [#allocation3], 0  ;;  %s747_s0 = inlined_call_operand.vmem [shape: f32[2,16,12], index: 0, kind: input, shape index: {}]   ;;  %s748_s1 = inlined_call_operand.vmem [shape: f32[8,12], index: 1, kind: input, shape index: {}]   ;;  %s749_s2 = inlined_call_operand.vmem [shape: f32[8,1], index: 2, kind: input, shape index: {}]   ;;  %s750_s3 = inlined_call_operand.hbm [shape: f32[2,8,16], index: 3, kind: output, shape index: {}]  }
   0x1   :  { %10 = vsyncpa [#allocation3 + $0x1], 0  ;;  %s641_s12 = smov 0   ;;  %s643_s13 = smov 0  }
   0x2   :  { %s645_s14 = smov 0   ;;  %s647_s15 = smov 0  }
   0x3   :  { %s649_s16 = smov 0   ;;  %s651_s17 = smov 0  }
   0x4 LB: > { %s470_s18 = sadd.s32 4294967295, %s618_s17   ;;  %s471_s19 = sadd.s32 4294967294, %s618_s17   ;;  %s618_s17 = sphi %s651_s17, %s16_s17   ;;  %s614_s16 = sphi %s649_s16, %s757_s16   ;;  %s610_s15 = sphi %s647_s15, %s756_s15   ;;  %s606_s14 = sphi %s645_s14, %s755_s14   ;;  %s602_s13 = sphi %s643_s13, %s754_s13   ;;  %s598_s12 = sphi %s641_s12, %s753_s12  }
   0x5   : > { %s28_s20 = sadd.s32 1, %s614_s16  ;;  %s107_s21 = sadd.s32 1, %s606_s14 }
   0x6   : > { %p30_p0 = scmp.ge.s32.totalorder %s28_s20, 2  ;;  %p117_p1 = scmp.ne.s32.totalorder %s606_s14, %s602_s13 }
   0x7   : > { %p118_p2 = scmp.eq.s32.totalorder %s470_s18, 1  ;;  %p123_p3 = scmp.ne.s32.totalorder %s602_s13, %s598_s12 }
   0x8   : > { %s759_s20 = smov (%p30_p0, %s28_s20), 0  ;;  %p124_p5 = scmp.eq.s32.totalorder %s471_s19, 1 }
   0x9   : > { %p681_p4 = por %p118_p2, %p117_p1  ;;  %s102_s23 = ssub.s32 %s614_s16, %s759_s20 }
   0xa   : > { %p474_p6 = scmp.ge.s32.totalorder %s618_s17, 1  ;;  %p105_p7 = scmp.eq.s32.totalorder %s102_s23, 0 }
   0xb   : > { %p688_p8 = por %p124_p5, %p123_p3  ;;  %p161_p9 = scmp.lt.s32.totalorder %s618_s17, 3 }
   0xc   : > { %s694_s25 = scalar_select %p105_p7, %s606_s14, %s107_s21  }
   0xd   : > { %p162_p10 = pnand %p474_p6, %p161_p9 }
   0xe   : > { %p190_p11 = scmp.lt.s32.totalorder (!%p162_p10), %s610_s15, 1  ;;  %s186_s8 = sand.u32 (!%p162_p10), 1, %s602_s13  }
   0xf   : > { %165 = sbr.rel (%p162_p10) target bundleno = 182 (0xb6), region = 32  ;;  %s475_s9 = sshll.u32 (!%p162_p10), %s186_s8, 3 }
  0x10   : > { %s479_s10 = sshll.u32 (!%p162_p10), %s610_s15, 3  ;;  %s188_s21 = scalar_lea.vmem (!%p162_p10), [#allocation2], %s475_s9 }
  0x11   : > { %s391_s19 = scalar_lea.hbm (!%p162_p10), %s750_s3, %s479_s10  ;;  %s393_s23 = sshll.u32 (!%p162_p10), %s188_s21, 4  ;;  %s394_s23 = int_to_ptr.vmem [resolvable:$true] %s393_s23 }
  0x12   : > { %s395_s26 = sshll.u32 (!%p162_p10), %s391_s19, 4  ;;  %s396_s26 = int_to_ptr.hbm [resolvable:$true] %s395_s26 }
  0x13   : > { %s554_s27 = sshra.s32 (!%p162_p10), %s396_s26, 4  ;;  %s555_s27 = int_to_ptr.hbm [resolvable:$true] %s554_s27 }
  0x14   : > { %vm208_vm0 = vcmask 97280   ;;  %v199_v0 = vld [vmem:[%s748_s1] sm:$0xff]  ;;  %v620_v2 = vmov 0   ;;  %s191_s30 = scalar_select %p190_p11, %s610_s15, 1  ;;  %vm377_vm1 = vcmask 130048  }
  0x15   : > { %v210_v1 = vsel %vm208_vm0, %v199_v0, 0  ;;  %539 = vset.pattern.permute.xlu0 %v620_v2  ;;  %v202_v3 = vld [vmem:[%s749_s2] sm:$0xff]  ;;  %s380_s15 = scalar_lea.sflag [#allocation3], %s186_s8  ;;  %s556_s28 = scalar_lea.hbm %s555_s27, 8 }
  0x16   : > { %v236_v4 = vand.u32 4294901760, %v210_v1  ;;  %205 = vperm.xlu0 %539, %v202_v3   ;;  %s482_s4 = sshll.u32 %s191_s30, 4  ;;  %p557_p12 = scmp.ne.s32.totalorder %s555_s27, %s556_s28 }
  0x17   : > { %s197_s7 = scalar_lea.vmem %s747_s0, %s482_s4  ;;  %s560_s4 = scalar_lea.hbm %s750_s3, 16 }
  0x18   : > { %v237_v5 = vsub.f32 %v210_v1, %v236_v4  ;;  %v201_v6 = vld [vmem:[%s197_s7 + $0x8] sm:$0xff]  ;;  %v200_v7 = vld [vmem:[%s197_s7] sm:$0xff]  ;;  %p558_p13 = pnand %p557_p12, %p681_p4  ;;  %p561_p1 = scmp.lt.s32.totalorder %s555_s27, %s750_s3 }
  0x19   : > { %v216_v9 = vsel %vm208_vm0, %v201_v6, 0  ;;  %v213_v10 = vsel %vm208_vm0, %v200_v7, 0  ;;  %p562_p2 = scmp.lt.s32.totalorder %s560_s4, %s556_s28 }
  0x1a   : > { %v238_v8 = vand.u32 4294901760, %v237_v5  ;;  %v232_v11 = vand.u32 4294901760, %v216_v9  ;;  %v234_v12 = vand.u32 4294901760, %v213_v10  ;;  %p559_p0 = pneg %p558_p13 }
  0x1b   : > { %p563_p3 = por %p562_p2, %p561_p1 }
  0x1c   : > { %v239_v13 = vsub.f32 %v237_v5, %v238_v8  ;;  %v260_v14 = vsub.f32 %v216_v9, %v232_v11  ;;  %233 = vmatpush.xpose.msra.mxu0 %v232_v11  ;;  %317 = vmatpush.xpose.msra.mxu3 %v232_v11  ;;  %v266_v15 = vsub.f32 %v213_v10, %v234_v12 }
  0x1d   : > { %p564_p5 = pnand %p563_p3, %p559_p0 }
  0x1e   : > { %292 = vmatpush.xpose.msra.mxu2 %v260_v14  ;;  %v261_v16 = vand.u32 4294901760, %v260_v14  ;;  %v267_v17 = vand.u32 4294901760, %v266_v15  ;;  %v240_v18 = vand.u32 4294901760, %v239_v13 }
  0x20   : > { %v262_v19 = vsub.f32 %v260_v14, %v261_v16  ;;  %235 = vmatpush.xpose.msra.mxu0 %v234_v12  ;;  %319 = vmatpush.xpose.msra.mxu3 %v234_v12  ;;  %v268_v20 = vsub.f32 %v266_v15, %v267_v17 }
  0x22   : > { %v263_v21 = vand.u32 4294901760, %v262_v19  ;;  %295 = vmatpush.xpose.msra.mxu2 %v266_v15  ;;  %v269_v22 = vand.u32 4294901760, %v268_v20 }
  0x23   : > { %241 = vmatmul.f32.vlgmr.msra.gmra.mxu0 %v240_v18  ;;  %323 = vmatmul.f32.vlgmr.msra.gmra.mxu3 %v238_v8 }
  0x24   : > { %344 = vmatpush.xpose.msrb.mxu0 %v261_v16  ;;  %264 = vmatpush.xpose.msra.mxu1 %v263_v21 }
  0x25   : > { %298 = vmatmul.f32.vlgmr.msra.gmra.mxu2 %v237_v5 }
  0x28   : > { %348 = vmatpush.xpose.msrb.mxu0 %v267_v17  ;;  %270 = vmatpush.xpose.msra.mxu1 %v269_v22 }
  0x2b   : > { %272 = vmatmul.f32.vlgmr.msra.gmra.mxu1 %v236_v4  ;;  %350 = vmatmul.f32.vlgmr.msrb.gmra.mxu0 %v236_v4 }
  0x2c   : > { %369 = vmatpush.xpose.msrb.mxu1 %v232_v11 }
  0x30   : > { %371 = vmatpush.xpose.msrb.mxu1 %v234_v12 }
  0x33   : > { %373 = vmatmul.f32.vlgmr.msrb.gmra.mxu1 %v236_v4 }
  0x88   : > { %v206_v23 = vpop.permute.xlu0 %205 }
  0xa0   : > { %v242_v24 = vpop.f32.mrf.mxu0 }
  0xa1   : > { %v243_v25 = vadd.f32 %v242_v24, %v206_v23 }
  0xa6   : > { %v324_v29 = vpop.f32.mrf.mxu3 }
  0xa8   : > { %v273_v26 = vpop.f32.mrf.mxu1  ;;  %v299_v27 = vpop.f32.mrf.mxu2 }
  0xa9   : > { %v274_v28 = vadd.f32 %v273_v26, %v243_v25  ;;  %v351_v31 = vpop.f32.mrf.mxu0 }
  0xab   : > { %v300_v30 = vadd.f32 %v299_v27, %v274_v28 }
  0xad   : > { %v325_v32 = vadd.f32 %v324_v29, %v300_v30 }
  0xaf   : > { %v352_v33 = vadd.f32 %v351_v31, %v325_v32 }
  0xb0   : > { %v374_v34 = vpop.f32.mrf.mxu1 }
  0xb1   : > { %v375_v35 = vadd.f32 %v374_v34, %v352_v33 }
  0xb3   : > { %378 = vst.msk [vmem:[%s188_s21] sm:$0xff] %vm377_vm1, %v375_v35 }
  0xb4   : > { %567 = shalt.err (!%p564_p5)
}
  0xb5   : > { %483 = dma.vmem_to_hbm [thread:$0]  (%p681_p4), %s394_s23, 128, %s396_s26, %s380_s15  }
  0xb6 PF: > { %p489_p6 = scmp.ge.s32.totalorder %s618_s17, 2  ;;  %s407_s7 = sand.u32 1, %s598_s12  }
  0xb7   : > { %s408_s8 = scalar_lea.sflag [#allocation3], %s407_s7 }
  0xb8   : > { %p486_p7 = pnand %p489_p6, %p688_p8 }
  0xba   : > { %p487_p9 = pneg %p486_p7 }
  0xbc   : > { %593 = dma.done.wait (%p487_p9), %s408_s8, 128  }
  0xbd   : > { %595 = vsyncadd (%p487_p9), %s408_s8, 4294967168  ;;  %s16_s17 = sadd.s32 1, %s618_s17   ;;  %s753_s12 = smov %s602_s13 }
  0xbe   : > { %p13_p10 = scmp.ge.s32.totalorder %s16_s17, 4   ;;  %s754_s13 = smov %s606_s14 }
  0xbf   : > { %s755_s14 = smov %s694_s25  ;;  %s756_s15 = smov %s614_s16 }
  0xc0   : > { %s757_s16 = smov %s759_s20  ;;  %15 = sbr.rel (!%p13_p10) target bundleno = 4 (0x4), region = 67 }
  0xc5   :  { %414 = vsyncpa [#allocation3], 1 }
  0xc6   :  { %416 = vsyncpa [#allocation3 + $0x1], 1 }

</bundles_post_ra>
